<compile_context>
chip_gen: v7x
topology: tpu7x:2x2x1
jax: 0.10.0
libtpu: 0.0.40
codegen_flags: <defaults>
</compile_context>

<pallas_src>
import functools

import jax
import jax.numpy as jnp
from jax import lax
from jax.experimental import pallas as pl
from jax.experimental.pallas import tpu as pltpu

BN_EPS = 1e-5


def _round_up(x, m):
    return (x + m - 1) // m * m


def _vmem_limits():
    """(per-block-set budget, scoped vmem_limit_bytes) for this TPU generation."""
    cap = 0
    try:
        cap = int(pltpu.get_tpu_info().vmem_capacity_bytes)
    except Exception:
        cap = 0
    if cap >= 100 * 1024 * 1024:          # 128 MiB parts (v5e / v6e)
        return 48 * 1024 * 1024, 96 * 1024 * 1024
    # v7x-class (64 MiB physical) or unknown: stay conservative.
    return 20 * 1024 * 1024, 44 * 1024 * 1024


# -----------------------------------------------------------------------------
# Pass 1: M-tiled matmul + per-tile partial batch-stat outputs (no carry).
# -----------------------------------------------------------------------------
def _matmul_stats_kernel(p_ref, w_ref, y_ref, psum_ref, psq_ref, *, tm, m_total):
    # (TM, Kp) @ (Kp, Fp) on the MXU with f32 accumulation.
    y = jnp.dot(p_ref[...], w_ref[...], preferred_element_type=jnp.float32)
    y_ref[...] = y.astype(y_ref.dtype)                    # raw conv output (bf16)

    # Mask out-of-range rows of the ragged last tile so padding garbage never
    # contributes to the batch statistics (OOB y writes are dropped by Pallas).
    row = pl.program_id(0) * tm + lax.broadcasted_iota(jnp.int32, y.shape, 0)
    ym = jnp.where(row < m_total, y, 0.0)
    psum_ref[...] = jnp.sum(ym, axis=0, keepdims=True)[None]        # (1, 1, Fp)
    psq_ref[...] = jnp.sum(ym * ym, axis=0, keepdims=True)[None]    # (1, 1, Fp)


# -----------------------------------------------------------------------------
# Pass 2: tiled y*scale + shift, ReLU, and in-kernel transpose to channel-major
# so the output store is lane-dense (last dim = spatial tile).
# -----------------------------------------------------------------------------
def _bn_relu_transpose_kernel(y_ref, scale_ref, shift_ref, o_ref, *, f_out):
    y = y_ref[0].astype(jnp.float32)                      # (TS, Fp)
    y = jnp.maximum(y * scale_ref[...] + shift_ref[...], 0.0)
    o_ref[...] = jnp.transpose(y, (1, 0))[None, :f_out, :]  # (1, F, TS) lane-dense


def _im2col(x_nchw, k_size, stride, padding, dilation):
    """Extract patches -> (N*OH*OW, C*KH*KW), ordered to match PyTorch weights."""
    n, c, h, w = x_nchw.shape
    kh = kw = k_size
    oh = (h + 2 * padding - dilation * (kh - 1) - 1) // stride + 1
    ow = (w + 2 * padding - dilation * (kw - 1) - 1) // stride + 1
    xp = jnp.pad(x_nchw, ((0, 0), (0, 0), (padding, padding), (padding, padding)))
    taps = []
    for ih in range(kh):                      # KH*KW slices only (C-independent)
        for iw in range(kw):
            h0 = ih * dilation
            w0 = iw * dilation
            taps.append(xp[:, :,
                           h0:h0 + (oh - 1) * stride + 1:stride,
                           w0:w0 + (ow - 1) * stride + 1:stride])  # (N,C,OH,OW)
    pat = jnp.stack(taps, axis=2)                         # (N, C, KH*KW, OH, OW)
    pat = pat.transpose(0, 3, 4, 1, 2)                    # (N, OH, OW, C, KH*KW)
    return pat.reshape(n * oh * ow, c * kh * kw), (n, oh, ow)


@functools.partial(
    jax.jit,
    static_argnames=("k_size", "stride", "padding", "dilation",
                     "block_m", "block_s", "matmul_dtype"))
def conv2d_batchnorm_relu(x_nchw, weight, bias, gamma, beta, *,
                          k_size, stride, padding, dilation,
                          block_m=1024, block_s=2048,
                          matmul_dtype=jnp.bfloat16):
    """Forward pass of conv2DBatchNormRelu (is_batchnorm=True)."""
    # The conv bias cancels exactly under training-mode BatchNorm (it shifts y
    # and its batch mean equally), so it is intentionally not applied.
    del bias

    budget, vmem_limit = _vmem_limits()

    n_filters, in_c, kh, kw = weight.shape
    x_lp = x_nchw.astype(matmul_dtype)            # cast BEFORE the im2col glue
    patches, (n, oh, ow) = _im2col(x_lp, k_size, stride, padding, dilation)
    m, k = patches.shape
    itm = jnp.dtype(matmul_dtype).itemsize

    # --- pad K and F to lane width (unmasked loads/stores, full MXU columns) --
    kp = _round_up(k, 128)
    fp = _round_up(n_filters, 128)
    if kp != k:
        patches = jnp.pad(patches, ((0, 0), (0, kp - k)))
    w_mat = weight.reshape(n_filters, k).T.astype(matmul_dtype)
    w_mat = jnp.pad(w_mat, ((0, kp - k), (0, fp - n_filters)))

    # --- M-tile size: multiple of 8 sublanes, shrunk to fit the VMEM budget ---
    tm = max(8, min(_round_up(block_m, 8), _round_up(m, 8)))

    def _est(t):  # double-buffered patch + y blocks, plus resident weights (x2)
        return 2 * t * kp * itm + 2 * t * fp * itm + 2 * kp * fp * itm

    while tm > 128 and _est(tm) > budget:
        tm = _round_up(tm // 2, 8)
    # TODO(synk): add a K grid axis (f32 VMEM accumulator, stats on last k step)
    # when resident (Kp, Fp) weights + a 128-row patch tile no longer fit VMEM.

    n_tiles = pl.cdiv(m, tm)

    cost1 = pl.CostEstimate(
        flops=2 * m * kp * fp,
        transcendentals=0,
        bytes_accessed=(m * kp * itm + kp * fp * itm + m * fp * itm
                        + 2 * n_tiles * fp * 4))

    kernel1 = functools.partial(_matmul_stats_kernel, tm=tm, m_total=m)
    y_raw, psum, psq = pl.pallas_call(
        kernel1,
        out_shape=(
            jax.ShapeDtypeStruct((m, fp), matmul_dtype),          # raw conv y
            jax.ShapeDtypeStruct((n_tiles, 1, fp), jnp.float32),  # partial sums
            jax.ShapeDtypeStruct((n_tiles, 1, fp), jnp.float32),  # partial sumsqs
        ),
        grid_spec=pltpu.PrefetchScalarGridSpec(
            num_scalar_prefetch=0,
            grid=(n_tiles,),
            in_specs=[
                pl.BlockSpec((tm, kp), lambda i: (i, 0)),         # patches tile
                pl.BlockSpec((kp, fp), lambda i: (0, 0)),         # weights (resident)
                # TODO(synk): pipeline_mode=pl.Buffered(1) on the weights (VMEM
                # headroom on v7x) and Buffered(3) on the patch stream if DMA
                # is exposed, once profiled.
            ],
            out_specs=(
                pl.BlockSpec((tm, fp), lambda i: (i, 0)),         # y tile
                pl.BlockSpec((1, 1, fp), lambda i: (i, 0, 0)),    # partial sum
                pl.BlockSpec((1, 1, fp), lambda i: (i, 0, 0)),    # partial sumsq
            )),
        compiler_params=pltpu.CompilerParams(
            dimension_semantics=("parallel",),   # no carry -> megacore-splittable
            vmem_limit_bytes=vmem_limit),
        cost_estimate=cost1,
    )(patches, w_mat)

    # --- fold BatchNorm into a single per-channel scale/shift (tiny XLA op) ---
    ch_sum = jnp.sum(psum, axis=0)[0, :n_filters]
    ch_sq = jnp.sum(psq, axis=0)[0, :n_filters]
    mean = ch_sum / m
    # TODO(synk): E[y^2]-E[y]^2 in f32 can cancel badly if |mean| >> std; switch
    # to a shifted two-pass accumulation if such activations appear.
    var = jnp.maximum(ch_sq / m - mean * mean, 0.0)       # biased variance
    scale = gamma * lax.rsqrt(var + BN_EPS)
    shift = beta - mean * scale
    scale_p = jnp.pad(scale.reshape(1, -1), ((0, 0), (0, fp - n_filters)))
    shift_p = jnp.pad(shift.reshape(1, -1), ((0, 0), (0, fp - n_filters)))

    # --- pass 2: spatial-tiled scale/shift + ReLU + NHWC->NCHW transpose ------
    s_spatial = oh * ow
    if s_spatial % 128 == 0:
        ts = max(128, min(_round_up(block_s, 128), s_spatial))
        while ts > 128 and (2 * ts * fp * itm + 2 * n_filters * ts * 4) > budget:
            ts = max(128, (ts // 2) // 128 * 128)
    elif s_spatial % 8 == 0:
        ts = s_spatial                         # whole-sample tile (block==full dim)
    else:
        ts = None

    use_pallas_ep = (ts is not None and
                     (2 * ts * fp * itm + 2 * n_filters * ts * 4) <= vmem_limit)

    if use_pallas_ep:
        n_s = pl.cdiv(s_spatial, ts)
        y_nsf = y_raw.reshape(n, s_spatial, fp)           # free: contiguous
        cost2 = pl.CostEstimate(
            flops=3 * n * s_spatial * fp,
            transcendentals=0,
            bytes_accessed=(n * s_spatial * fp * itm
                            + n * n_filters * s_spatial * 4 + 2 * fp * 4))
        kernel2 = functools.partial(_bn_relu_transpose_kernel, f_out=n_filters)
        out_nfs = pl.pallas_call(
            kernel2,
            out_shape=jax.ShapeDtypeStruct((n, n_filters, s_spatial), jnp.float32),
            grid=(n, n_s),
            in_specs=[
                pl.BlockSpec((1, ts, fp), lambda b, s: (b, s, 0)),
                pl.BlockSpec((1, fp), lambda b, s: (0, 0)),
                pl.BlockSpec((1, fp), lambda b, s: (0, 0)),
            ],
            out_specs=pl.BlockSpec((1, n_filters, ts), lambda b, s: (b, 0, s)),
            compiler_params=pltpu.CompilerParams(
                dimension_semantics=("parallel", "parallel"),
                vmem_limit_bytes=vmem_limit),
            cost_estimate=cost2,
        )(y_nsf, scale_p, shift_p)
        out = out_nfs.reshape(n, n_filters, oh, ow)       # free: contiguous
    else:
        # Layout fallback: plain-XLA epilogue for awkward spatial extents.
        y_valid = (y_raw[:, :n_filters].astype(jnp.float32)
                   .reshape(n, oh, ow, n_filters))
        out = jnp.transpose(jnp.maximum(y_valid * scale + shift, 0.0),
                            (0, 3, 1, 2))
    return out


if __name__ == "__main__":
    # conv2DBatchNormRelu(in_channels=4, n_filters=8, k_size=3, stride=1,
    #                     padding=1, bias=True, dilation=1, is_batchnorm=True)
    in_channels, n_filters, k_size, stride, padding, dilation = 4, 8, 3, 1, 1, 1
    N, H, W = 2, 16, 16

    key = jax.random.PRNGKey(0)
    kx, kw_, kb, kg, kbe = jax.random.split(key, 5)
    x = jax.random.normal(kx, (N, in_channels, H, W), dtype=jnp.float32)
    weight = 0.1 * jax.random.normal(
        kw_, (n_filters, in_channels, k_size, k_size), dtype=jnp.float32)
    bias = 0.1 * jax.random.normal(kb, (n_filters,), dtype=jnp.float32)
    gamma = 1.0 + 0.1 * jax.random.normal(kg, (n_filters,), dtype=jnp.float32)
    beta = 0.1 * jax.random.normal(kbe, (n_filters,), dtype=jnp.float32)

    # Small tiles so the toy problem (M = 512, S = 256) still exercises
    # multi-tile partial stats, the ragged last M tile, and spatial tiling;
    # production uses the defaults (block_m=1024, block_s=2048).
    out = conv2d_batchnorm_relu(
        x, weight, bias, gamma, beta,
        k_size=k_size, stride=stride, padding=padding, dilation=dilation,
        block_m=192, block_s=128)
    jax.block_until_ready(out)
    assert out.shape == (N, n_filters, H, W), out.shape

    # Reference check (plain XLA, f32); tolerance covers the bf16 MXU inputs
    # and the bf16 intermediate y.
    conv_ref = lax.conv_general_dilated(
        x, weight, window_strides=(stride, stride),
        padding=[(padding, padding), (padding, padding)],
        rhs_dilation=(dilation, dilation),
        dimension_numbers=("NCHW", "OIHW", "NCHW")) + bias[None, :, None, None]
    mu = conv_ref.mean(axis=(0, 2, 3), keepdims=True)
    var = conv_ref.var(axis=(0, 2, 3), keepdims=True)
    ref = jnp.maximum(
        (conv_ref - mu) * lax.rsqrt(var + BN_EPS) * gamma[None, :, None, None]
        + beta[None, :, None, None], 0.0)
    max_err = float(jnp.max(jnp.abs(out - ref)))
    assert max_err < 0.1, max_err

    print("KERNEL_OK")
</pallas_src>

<mosaic_0001>
module attributes {stable_mosaic.version = 11 : i64} {
  func.func @_matmul_stats_kernel(%arg0: i32, %arg1: memref<192x128xbf16, #tpu.memory_space<vmem>>, %arg2: memref<128x128xbf16, #tpu.memory_space<vmem>>, %arg3: memref<192x128xbf16, #tpu.memory_space<vmem>>, %arg4: memref<1x1x128xf32, #tpu.memory_space<vmem>>, %arg5: memref<1x1x128xf32, #tpu.memory_space<vmem>>) attributes {dimension_semantics = [#tpu.dimension_semantics<parallel>], iteration_bounds = array<i64: 3>, scalar_prefetch = 0 : i64, scratch_operands = 0 : i64, tpu.core_type = #tpu.core_type<tc>, window_params = [{transform_indices = @transform_0, window_bounds = array<i64: 192, 128>}, {pipeline_mode = #tpu.pipeline_mode<synchronous>, transform_indices = @transform_1, window_bounds = array<i64: 128, 128>}, {transform_indices = @transform_2, window_bounds = array<i64: 192, 128>}, {transform_indices = @transform_3, window_bounds = array<i64: 1, 1, 128>}, {transform_indices = @transform_4, window_bounds = array<i64: 1, 1, 128>}]} {
    %c0 = arith.constant 0 : index
    %c0_0 = arith.constant 0 : index
    %0 = vector.load %arg1[%c0, %c0_0] : memref<192x128xbf16, #tpu.memory_space<vmem>>, vector<192x128xbf16>
    %c0_1 = arith.constant 0 : index
    %c0_2 = arith.constant 0 : index
    %1 = vector.load %arg2[%c0_1, %c0_2] : memref<128x128xbf16, #tpu.memory_space<vmem>>, vector<128x128xbf16>
    %cst = arith.constant dense<0.000000e+00> : vector<192x128xf32>
    %2 = tpu.matmul %0, %1, %cst {dimension_numbers = #tpu.dot_dimension_numbers<[1], [0], [0], [1], [0, 0, 1, 1], [], []>} : vector<192x128xbf16>, vector<128x128xbf16>, vector<192x128xf32> -> vector<192x128xf32>
    %3 = arith.truncf %2 : vector<192x128xf32> to vector<192x128xbf16>
    %c0_3 = arith.constant 0 : index
    %c0_4 = arith.constant 0 : index
    %4 = vector.load %arg3[%c0_3, %c0_4] : memref<192x128xbf16, #tpu.memory_space<vmem>>, vector<192x128xbf16>
    tpu.vector_store %arg3[%c0_3, %c0_4], %3 {strides = array<i32>} : memref<192x128xbf16, #tpu.memory_space<vmem>>, vector<192x128xbf16>,
    %c192_i32 = arith.constant 192 : i32
    %5 = arith.muli %arg0, %c192_i32 : i32
    %6 = tpu.iota {dimensions = array<i32: 0>} : vector<192x128xi32>
    %7 = vector.broadcast %5 : i32 to vector<192x128xi32>
    %8 = arith.addi %7, %6 : vector<192x128xi32>
    %c512_i32 = arith.constant 512 : i32
    %9 = vector.broadcast %c512_i32 : i32 to vector<192x128xi32>
    %10 = arith.cmpi slt, %8, %9 : vector<192x128xi32>
    %cst_5 = arith.constant 0.000000e+00 : f32
    %11 = vector.broadcast %cst_5 : f32 to vector<192x128xf32>
    %12 = arith.select %10, %2, %11 : vector<192x128xi1>, vector<192x128xf32>
    %cst_6 = arith.constant dense<0.000000e+00> : vector<128xf32>
    %13 = vector.multi_reduction <add>, %12, %cst_6 [0] : vector<192x128xf32> to vector<128xf32>
    %14 = vector.shape_cast %13 : vector<128xf32> to vector<1x128xf32>
    %15 = vector.shape_cast %14 : vector<1x128xf32> to vector<1x1x128xf32>
    %c0_7 = arith.constant 0 : index
    %c0_8 = arith.constant 0 : index
    %c0_9 = arith.constant 0 : index
    %16 = vector.load %arg4[%c0_7, %c0_8, %c0_9] : memref<1x1x128xf32, #tpu.memory_space<vmem>>, vector<1x1x128xf32>
    tpu.vector_store %arg4[%c0_7, %c0_8, %c0_9], %15 {strides = array<i32>} : memref<1x1x128xf32, #tpu.memory_space<vmem>>, vector<1x1x128xf32>,
    %17 = arith.mulf %12, %12 : vector<192x128xf32>
    %cst_10 = arith.constant dense<0.000000e+00> : vector<128xf32>
    %18 = vector.multi_reduction <add>, %17, %cst_10 [0] : vector<192x128xf32> to vector<128xf32>
    %19 = vector.shape_cast %18 : vector<128xf32> to vector<1x128xf32>
    %20 = vector.shape_cast %19 : vector<1x128xf32> to vector<1x1x128xf32>
    %c0_11 = arith.constant 0 : index
    %c0_12 = arith.constant 0 : index
    %c0_13 = arith.constant 0 : index
    %21 = vector.load %arg5[%c0_11, %c0_12, %c0_13] : memref<1x1x128xf32, #tpu.memory_space<vmem>>, vector<1x1x128xf32>
    tpu.vector_store %arg5[%c0_11, %c0_12, %c0_13], %20 {strides = array<i32>} : memref<1x1x128xf32, #tpu.memory_space<vmem>>, vector<1x1x128xf32>,
    return
  }
  func.func @transform_0(%arg0: i32) -> (i32, i32) {
    %c0_i32 = arith.constant 0 : i32
    %c0_i32_0 = arith.constant 0 : i32
    return %arg0, %c0_i32 : i32, i32
  }
  func.func @transform_1(%arg0: i32) -> (i32, i32) {
    %c0_i32 = arith.constant 0 : i32
    %c0_i32_0 = arith.constant 0 : i32
    %c0_i32_1 = arith.constant 0 : i32
    return %c0_i32, %c0_i32_0 : i32, i32
  }
  func.func @transform_2(%arg0: i32) -> (i32, i32) {
    %c0_i32 = arith.constant 0 : i32
    %c0_i32_0 = arith.constant 0 : i32
    return %arg0, %c0_i32 : i32, i32
  }
  func.func @transform_3(%arg0: i32) -> (i32, i32, i32) {
    %c0_i32 = arith.constant 0 : i32
    %c0_i32_0 = arith.constant 0 : i32
    %c0_i32_1 = arith.constant 0 : i32
    return %arg0, %c0_i32, %c0_i32_0 : i32, i32, i32
  }
  func.func @transform_4(%arg0: i32) -> (i32, i32, i32) {
    %c0_i32 = arith.constant 0 : i32
    %c0_i32_0 = arith.constant 0 : i32
    %c0_i32_1 = arith.constant 0 : i32
    return %arg0, %c0_i32, %c0_i32_0 : i32, i32, i32
  }
}

module attributes {stable_mosaic.version = 11 : i64} {
  func.func @_bn_relu_transpose_kernel(%arg0: i32, %arg1: i32, %arg2: memref<1x128x128xbf16, #tpu.memory_space<vmem>>, %arg3: memref<1x128xf32, #tpu.memory_space<vmem>>, %arg4: memref<1x128xf32, #tpu.memory_space<vmem>>, %arg5: memref<1x8x128xf32, #tpu.memory_space<vmem>>) attributes {dimension_semantics = [#tpu.dimension_semantics<parallel>, #tpu.dimension_semantics<parallel>], iteration_bounds = array<i64: 2, 2>, scalar_prefetch = 0 : i64, scratch_operands = 0 : i64, tpu.core_type = #tpu.core_type<tc>, window_params = [{transform_indices = @transform_0, window_bounds = array<i64: 1, 128, 128>}, {pipeline_mode = #tpu.pipeline_mode<synchronous>, transform_indices = @transform_1, window_bounds = array<i64: 1, 128>}, {pipeline_mode = #tpu.pipeline_mode<synchronous>, transform_indices = @transform_2, window_bounds = array<i64: 1, 128>}, {transform_indices = @transform_3, window_bounds = array<i64: 1, 8, 128>}]} {
    %c0 = arith.constant 0 : index
    %c0_0 = arith.constant 0 : index
    %c0_1 = arith.constant 0 : index
    %0 = vector.load %arg2[%c0, %c0_0, %c0_1] : memref<1x128x128xbf16, #tpu.memory_space<vmem>>, vector<1x128x128xbf16>
    %1 = vector.shape_cast %0 : vector<1x128x128xbf16> to vector<128x128xbf16>
    %2 = arith.extf %1 : vector<128x128xbf16> to vector<128x128xf32>
    %c0_2 = arith.constant 0 : index
    %c0_3 = arith.constant 0 : index
    %3 = vector.load %arg3[%c0_2, %c0_3] : memref<1x128xf32, #tpu.memory_space<vmem>>, vector<1x128xf32>
    %4 = vector.broadcast %3 : vector<1x128xf32> to vector<128x128xf32>
    %5 = arith.mulf %2, %4 : vector<128x128xf32>
    %c0_4 = arith.constant 0 : index
    %c0_5 = arith.constant 0 : index
    %6 = vector.load %arg4[%c0_4, %c0_5] : memref<1x128xf32, #tpu.memory_space<vmem>>, vector<1x128xf32>
    %7 = vector.broadcast %6 : vector<1x128xf32> to vector<128x128xf32>
    %8 = arith.addf %5, %7 : vector<128x128xf32>
    %cst = arith.constant 0.000000e+00 : f32
    %9 = vector.broadcast %cst : f32 to vector<128x128xf32>
    %10 = arith.maximumf %8, %9 : vector<128x128xf32>
    %11 = tpu.transpose %10, [1, 0] : vector<128x128xf32> -> vector<128x128xf32>
    %12 = vector.extract_strided_slice %11 {offsets = [0, 0], sizes = [8, 128], strides = [1, 1]} : vector<128x128xf32> to vector<8x128xf32>
    %13 = vector.shape_cast %12 : vector<8x128xf32> to vector<1x8x128xf32>
    %c0_6 = arith.constant 0 : index
    %c0_7 = arith.constant 0 : index
    %c0_8 = arith.constant 0 : index
    %14 = vector.load %arg5[%c0_6, %c0_7, %c0_8] : memref<1x8x128xf32, #tpu.memory_space<vmem>>, vector<1x8x128xf32>
    tpu.vector_store %arg5[%c0_6, %c0_7, %c0_8], %13 {strides = array<i32>} : memref<1x8x128xf32, #tpu.memory_space<vmem>>, vector<1x8x128xf32>,
    return
  }
  func.func @transform_0(%arg0: i32, %arg1: i32) -> (i32, i32, i32) {
    %c0_i32 = arith.constant 0 : i32
    %c0_i32_0 = arith.constant 0 : i32
    return %arg0, %arg1, %c0_i32 : i32, i32, i32
  }
  func.func @transform_1(%arg0: i32, %arg1: i32) -> (i32, i32) {
    %c0_i32 = arith.constant 0 : i32
    %c0_i32_0 = arith.constant 0 : i32
    %c0_i32_1 = arith.constant 0 : i32
    return %c0_i32, %c0_i32_0 : i32, i32
  }
  func.func @transform_2(%arg0: i32, %arg1: i32) -> (i32, i32) {
    %c0_i32 = arith.constant 0 : i32
    %c0_i32_0 = arith.constant 0 : i32
    %c0_i32_1 = arith.constant 0 : i32
    return %c0_i32, %c0_i32_0 : i32, i32
  }
  func.func @transform_3(%arg0: i32, %arg1: i32) -> (i32, i32, i32) {
    %c0_i32 = arith.constant 0 : i32
    %c0_i32_0 = arith.constant 0 : i32
    return %arg0, %c0_i32, %arg1 : i32, i32, i32
  }
}

</mosaic_0001>

<bundles_post_ra>
// kernel: conv2d_batchnorm_relu.3
= control target key start
LH: loop header
LB: loop body
LE: loop exit
PB: predicated region body
PF: predicated region fallthrough
CT: control target
= control target key end

     0   :  { %s573_s12 = smov 0   ;;  %s575_s13 = smov 0   ;;  %s685_s0 = inlined_call_operand.vmem [shape: bf16[2,256,128], index: 0, kind: input, shape index: {}]   ;;  %s686_s1 = inlined_call_operand.vmem [shape: f32[1,128], index: 1, kind: input, shape index: {}]   ;;  %s687_s2 = inlined_call_operand.vmem [shape: f32[1,128], index: 2, kind: input, shape index: {}]   ;;  %s688_s3 = inlined_call_operand.vmem [shape: f32[2,8,256], index: 3, kind: output, shape index: {}]  }
   0x1   :  { %s577_s14 = smov 0   ;;  %s579_s15 = smov 0  }
   0x2   :  { %s581_s16 = smov 0  }
   0x3 LB: > { %s22_s17 = sadd.s32 1, %s543_s14  ;;  %s25_s18 = sadd.s32 1, %s547_s15  ;;  %s551_s16 = sphi %s581_s16, %s13_s16   ;;  %s547_s15 = sphi %s579_s15, %s692_s15   ;;  %s543_s14 = sphi %s577_s14, %s691_s14   ;;  %s539_s13 = sphi %s575_s13, %s690_s13   ;;  %s535_s12 = sphi %s573_s12, %s689_s12  }
   0x4   : > { %p23_p0 = scmp.ge.s32.totalorder %s22_s17, 2  ;;  %p424_p1 = scmp.ge.s32.totalorder %s551_s16, 1 }
   0x5   : > { %p158_p2 = scmp.lt.s32.totalorder %s551_s16, 5 }
   0x6   : > { %s694_s17 = smov (%p23_p0, %s22_s17), 0  ;;  %s696_s18 = smov (!%p23_p0, %s25_s18), %s547_s15 }
   0x7   : > { %p159_p3 = pnand %p424_p1, %p158_p2  ;;  %p27_p4 = scmp.ge.s32.totalorder %s696_s18, 2 }
   0x8   : > { %s425_s19 = sshll.u32 (!%p159_p3), %s535_s12, 4  ;;  %p190_p5 = scmp.lt.s32.totalorder (!%p159_p3), %s539_s13, 1  ;;  %v618_v1 = vld [vmem:[%s686_s1] ss:$0 sm:$0xff] (!%p159_p3) }
   0x9   : > { %s698_s18 = smov (%p27_p4, %s696_s18), 0  ;;  %162 = sbr.rel (%p159_p3) target bundleno = 160 (0xa0), region = 32 }
   0xa   : > { %p192_p6 = scmp.lt.s32.totalorder (!%p159_p3), %s425_s19, 31  ;;  %v624_v6 = vld [vmem:[%s687_s2] ss:$0 sm:$0xff] (!%p159_p3)  ;;  %p201_p7 = scmp.lt.s32.totalorder (!%p159_p3), %s535_s12, 1 }
  0x10   : > { %s700_s13 = smov (!%p190_p5, %s539_s13), 1  ;;  %s702_s19 = smov (!%p192_p6, %s425_s19), 31 }
  0x11   : > { %s426_s20 = sshll.u32 %s700_s13, 5  ;;  %s704_s12 = smov (!%p201_p7, %s535_s12), 1 }
  0x12   : > { %s195_s21 = sadd.s32 %s426_s20, %s702_s19  ;;  %s428_s30 = sshll.u32 %s700_s13, 1 }
  0x13   : > { %s427_s22 = sshll.u32 %s195_s21, 2  ;;  %s204_s4 = sadd.s32 %s428_s30, %s704_s12 }
  0x14   : > { %s612_s25 = scalar_lea.vmem %s685_s0, %s427_s22  ;;  %s429_s5 = sshll.u32 %s204_s4, 3 }
  0x15   : > { %v435_v0 = vld [vmem:[%s612_s25] sm:$0xff]   ;;  %v466_v2 = vld [vmem:[%s612_s25 + $0x8] sm:$0xff]   ;;  %v467_v13 = vld [vmem:[%s612_s25 + $0x10] sm:$0xff]   ;;  %s206_s8 = scalar_lea.vmem %s688_s3, %s429_s5 }
  0x16   : > { %v436_v3 = vunpack.c.l.bf16 %v435_v0  ;;  %v437_v4 = vunpack.c.h.bf16 %v435_v0  ;;  %v440_v5 = vunpack.c.l.bf16 %v466_v2  ;;  %v441_v12 = vunpack.c.h.bf16 %v466_v2  ;;  %v468_v23 = vld [vmem:[%s612_s25 + $0x18] sm:$0xff]   ;;  %v469_v32 = vld [vmem:[%s612_s25 + $0x20] sm:$0xff]   ;;  %v470_v41 = vld [vmem:[%s612_s25 + $0x28] sm:$0xff]  }
  0x17   : > { %v444_v18 = vunpack.c.l.bf16 %v467_v13  ;;  %v445_v22 = vunpack.c.h.bf16 %v467_v13  ;;  %v448_v27 = vunpack.c.l.bf16 %v468_v23  ;;  %v449_v31 = vunpack.c.h.bf16 %v468_v23  ;;  %v471_v50 = vld [vmem:[%s612_s25 + $0x30] sm:$0xff]   ;;  %v472_v59 = vld [vmem:[%s612_s25 + $0x38] sm:$0xff]  }
  0x18   : > { %v246_v7 = vmul.f32 %v436_v3, %v618_v1  ;;  %v247_v8 = vmul.f32 %v437_v4, %v618_v1  ;;  %v248_v11 = vmul.f32 %v440_v5, %v618_v1  ;;  %v249_v17 = vmul.f32 %v441_v12, %v618_v1 }
  0x19   : > { %v250_v21 = vmul.f32 %v444_v18, %v618_v1  ;;  %v251_v26 = vmul.f32 %v445_v22, %v618_v1  ;;  %v252_v30 = vmul.f32 %v448_v27, %v618_v1  ;;  %v253_v35 = vmul.f32 %v449_v31, %v618_v1 }
  0x1a   : > { %v269_v9 = vadd.f32 %v624_v6, %v246_v7  ;;  %v270_v10 = vadd.f32 %v624_v6, %v247_v8  ;;  %v271_v16 = vadd.f32 %v624_v6, %v248_v11  ;;  %v272_v20 = vadd.f32 %v624_v6, %v249_v17 }
  0x1b   : > { %v273_v25 = vadd.f32 %v624_v6, %v250_v21  ;;  %v274_v29 = vadd.f32 %v624_v6, %v251_v26  ;;  %v275_v34 = vadd.f32 %v624_v6, %v252_v30  ;;  %v452_v36 = vunpack.c.l.bf16 %v469_v32 }
  0x1c   : > { %v285_v14 = vmax.f32 %v269_v9, 0.0  ;;  %v286_v15 = vmax.f32 %v270_v10, 0.0  ;;  %v287_v19 = vmax.f32 %v271_v16, 0.0  ;;  %v288_v24 = vmax.f32 %v272_v20, 0.0 }
  0x1d   : > { %v289_v28 = vmax.f32 %v273_v25, 0.0  ;;  %v290_v33 = vmax.f32 %v274_v29, 0.0  ;;  %v291_v37 = vmax.f32 %v275_v34, 0.0  ;;  %v276_v38 = vadd.f32 %v624_v6, %v253_v35 }
  0x1e   : > { %301 = vxpose.xlu0.b32.start [1/16] (narrow) %v285_v14, 8  ;;  %v254_v39 = vmul.f32 %v452_v36, %v618_v1  ;;  %v453_v40 = vunpack.c.h.bf16 %v469_v32  ;;  %v456_v45 = vunpack.c.l.bf16 %v470_v41  ;;  %v457_v49 = vunpack.c.h.bf16 %v470_v41 }
  0x1f   : > { %v292_v42 = vmax.f32 %v276_v38, 0.0  ;;  %v460_v54 = vunpack.c.l.bf16 %v471_v50  ;;  %v461_v58 = vunpack.c.h.bf16 %v471_v50  ;;  %v464_v63 = vunpack.c.l.bf16 %v472_v59 }
  0x20   : > { %v277_v43 = vadd.f32 %v624_v6, %v254_v39  ;;  %v255_v44 = vmul.f32 %v453_v40, %v618_v1  ;;  %v256_v48 = vmul.f32 %v456_v45, %v618_v1  ;;  %v257_v53 = vmul.f32 %v457_v49, %v618_v1 }
  0x21   : > { %v258_v57 = vmul.f32 %v460_v54, %v618_v1  ;;  %v259_v62 = vmul.f32 %v461_v58, %v618_v1  ;;  %v260_v3 = vmul.f32 %v464_v63, %v618_v1  ;;  %v465_v4 = vunpack.c.h.bf16 %v472_v59 }
  0x22   : > { %302 = vxpose.xlu0.b32.cont [2/16] (narrow) %v286_v15, 8  ;;  %v293_v46 = vmax.f32 %v277_v43, 0.0  ;;  %v278_v47 = vadd.f32 %v624_v6, %v255_v44  ;;  %v279_v52 = vadd.f32 %v624_v6, %v256_v48  ;;  %v280_v56 = vadd.f32 %v624_v6, %v257_v53 }
  0x23   : > { %v281_v61 = vadd.f32 %v624_v6, %v258_v57  ;;  %v282_v2 = vadd.f32 %v624_v6, %v259_v62  ;;  %v283_v7 = vadd.f32 %v624_v6, %v260_v3  ;;  %v261_v8 = vmul.f32 %v465_v4, %v618_v1 }
  0x24   : > { %v294_v51 = vmax.f32 %v278_v47, 0.0  ;;  %v295_v55 = vmax.f32 %v279_v52, 0.0  ;;  %v296_v60 = vmax.f32 %v280_v56, 0.0 }
  0x25   : > { %v297_v0 = vmax.f32 %v281_v61, 0.0  ;;  %v298_v5 = vmax.f32 %v282_v2, 0.0  ;;  %v299_v9 = vmax.f32 %v283_v7, 0.0  ;;  %v284_v10 = vadd.f32 %v624_v6, %v261_v8 }
  0x26   : > { %303 = vxpose.xlu0.b32.cont [3/16] (narrow) %v287_v19, 8 }
  0x27   : > { %v300_v11 = vmax.f32 %v284_v10, 0.0 }
  0x2a   : > { %304 = vxpose.xlu0.b32.cont [4/16] (narrow) %v288_v24, 8 }
  0x2e   : > { %305 = vxpose.xlu0.b32.cont [5/16] (narrow) %v289_v28, 8 }
  0x32   : > { %306 = vxpose.xlu0.b32.cont [6/16] (narrow) %v290_v33, 8 }
  0x36   : > { %307 = vxpose.xlu0.b32.cont [7/16] (narrow) %v291_v37, 8 }
  0x3a   : > { %308 = vxpose.xlu0.b32.cont [8/16] (narrow) %v292_v42, 8 }
  0x3e   : > { %309 = vxpose.xlu0.b32.cont [9/16] (narrow) %v293_v46, 8 }
  0x42   : > { %310 = vxpose.xlu0.b32.cont [10/16] (narrow) %v294_v51, 8 }
  0x46   : > { %311 = vxpose.xlu0.b32.cont [11/16] (narrow) %v295_v55, 8 }
  0x4a   : > { %312 = vxpose.xlu0.b32.cont [12/16] (narrow) %v296_v60, 8 }
  0x4e   : > { %313 = vxpose.xlu0.b32.cont [13/16] (narrow) %v297_v0, 8 }
  0x52   : > { %314 = vxpose.xlu0.b32.cont [14/16] (narrow) %v298_v5, 8 }
  0x56   : > { %315 = vxpose.xlu0.b32.cont [15/16] (narrow) %v299_v9, 8 }
  0x5a   : > { %316 = vxpose.xlu0.b32.end [16/16] (narrow) %v300_v11, 8 }
  0x9e   : > { %v317_v12 = vpop.trf.xlu0 }
  0x9f   : > { %333 = vst [vmem:[%s206_s8] sm:$0xff] %v317_v12 }
  0xa0 PF: > { %s13_s16 = sadd.s32 1, %s551_s16   ;;  %s689_s12 = smov %s543_s14 }
  0xa1   : > { %p10_p8 = scmp.ge.s32.totalorder %s13_s16, 6   ;;  %s690_s13 = smov %s547_s15 }
  0xa2   : > { %s691_s14 = smov %s694_s17  ;;  %s692_s15 = smov %s698_s18 }
  0xa3   :  { %12 = sbr.rel (!%p10_p8) target bundleno = 3 (0x3), region = 62 }

// kernel: conv2d_batchnorm_relu.2
= control target key start
LH: loop header
LB: loop body
LE: loop exit
PB: predicated region body
PF: predicated region fallthrough
CT: control target
= control target key end

     0   :  { %s1647_s15 = smov 0   ;;  %s1649_s16 = smov 0   ;;  %s1984_s0 = inlined_call_operand.vmem [shape: bf16[512,128], index: 0, kind: input, shape index: {}]   ;;  %s1985_s1 = inlined_call_operand.vmem [shape: bf16[128,128], index: 1, kind: input, shape index: {}]   ;;  %s1986_s2 = inlined_call_operand.vmem [shape: bf16[512,128], index: 2, kind: output, shape index: {0}]   ;;  %s1987_s3 = inlined_call_operand.vmem [shape: f32[3,1,128], index: 3, kind: output, shape index: {1}]   ;;  %s1988_s4 = inlined_call_operand.vmem [shape: f32[3,1,128], index: 4, kind: output, shape index: {2}]  }
   0x1   :  { %s1651_s17 = smov 0  }
   0x2 LB: > { %s1660_s18 = sadd.s32 4294967295, %s1588_s17   ;;  %s1662_s19 = sadd.s32 1, %s1588_s17   ;;  %s1588_s17 = sphi %s1651_s17, %s1995_s17   ;;  %s1584_s16 = sphi %s1649_s16, %s1994_s16   ;;  %s1580_s15 = sphi %s1647_s15, %s1993_s15  }
   0x3   : > { %s66_s20 = ssub.s32 %s1588_s17, %s1662_s19  ;;  %s69_s21 = sadd.s32 1, %s1584_s16 }
   0x4   : > { %p67_p0 = scmp.eq.s32.totalorder %s66_s20, 0  ;;  %p79_p1 = scmp.ne.s32.totalorder %s1584_s16, %s1580_s15 }
   0x5   : > { %p80_p2 = scmp.eq.s32.totalorder %s1660_s18, 2  ;;  %p1190_p3 = scmp.ge.s32.totalorder %s1588_s17, 1 }
   0x6   : > { %s1670_s22 = scalar_select %p67_p0, %s1584_s16, %s69_s21  }
   0x7   : > { %p1672_p4 = por %p80_p2, %p79_p1  ;;  %p176_p5 = scmp.lt.s32.totalorder %s1588_s17, 4 }
   0x9   : > { %p177_p6 = pnand %p1190_p3, %p176_p5 }
   0xa   : > { %v1510_v0 = vld [vmem:[%s1985_s1] sm:$0xff] (!%p177_p6)   ;;  %s1680_s26 = smul.u32 (!%p177_p6), 24, %s1660_s18  ;;  %v1511_v1 = vld [vmem:[%s1985_s1 + $0x8] sm:$0xff] (!%p177_p6)   ;;  %v1512_v2 = vld [vmem:[%s1985_s1 + $0x10] sm:$0xff] (!%p177_p6)   ;;  %v647_v20 = vlaneseq (!%p177_p6)  ;;  %s198_s28 = sand.u32 (!%p177_p6), 1, %s1580_s15  }
   0xb   : > { %180 = sbr.rel (%p177_p6) target bundleno = 397 (0x18d), region = 28  ;;  %1364 = vmatprep.subr.bf16.mxu0 (!%p177_p6), %v1510_v0  ;;  %1404 = vmatprep.subr.bf16.mxu1 (!%p177_p6), %v1510_v0  ;;  %v1513_v3 = vld [vmem:[%s1985_s1 + $0x18] sm:$0xff] (!%p177_p6)   ;;  %v1514_v5 = vld [vmem:[%s1985_s1 + $0x20] sm:$0xff] (!%p177_p6)   ;;  %v1515_v7 = vld [vmem:[%s1985_s1 + $0x28] sm:$0xff] (!%p177_p6)   ;;  %p230_p8 = scmp.lt.s32.totalorder (!%p177_p6), %s1660_s18, 2 }
   0xc   : > { %p216_p7 = scmp.lt.s32.totalorder (!%p177_p6), %s1680_s26, 63  ;;  %1365 = vmatpush3.bf16.msra.mxu0 (!%p177_p6), %v1510_v0  ;;  %1412 = vmatpush3.bf16.msra.mxu1 (!%p177_p6), %v1510_v0  ;;  %v1516_v8 = vld [vmem:[%s1985_s1 + $0x30] sm:$0xff] (!%p177_p6)   ;;  %v1517_v9 = vld [vmem:[%s1985_s1 + $0x38] sm:$0xff] (!%p177_p6)   ;;  %s646_s27 = smul.u32 (!%p177_p6), 192, %s1660_s18  ;;  %v1723_v21 = vshrl.u32 (!%p177_p6), %v647_v20, 7 }
   0xd   : > { %1366 = vmatprep.subr.bf16.mxu0 (!%p177_p6), %v1511_v1  ;;  %1405 = vmatprep.subr.bf16.mxu1 (!%p177_p6), %v1511_v1  ;;  %s1420_s29 = smul.u32 (!%p177_p6), 96, %s198_s28 }
   0xe   : > { %v1725_v22 = vstv (!%p177_p6), %s646_s27  ;;  %v650_v23 = vadd.s32 (!%p177_p6), 16, %v1723_v21  ;;  %v651_v24 = vadd.s32 (!%p177_p6), 24, %v1723_v21  ;;  %v649_v25 = vadd.s32 (!%p177_p6), 8, %v1723_v21 }
   0xf   : > { %v673_v26 = vadd.s32 (!%p177_p6), %v1725_v22, %v1723_v21  ;;  %v654_v30 = vadd.s32 (!%p177_p6), 48, %v1723_v21  ;;  %v652_v31 = vadd.s32 (!%p177_p6), 32, %v1723_v21  ;;  %v655_v32 = vadd.s32 (!%p177_p6), 56, %v1723_v21  ;;  %s1761_s15 = scalar_lea.vmem (!%p177_p6), [#allocation2], %s1420_s29  }
  0x10   : > { %1367 = vmatpush3.bf16.msra.mxu0 (!%p177_p6), %v1511_v1  ;;  %1413 = vmatpush3.bf16.msra.mxu1 (!%p177_p6), %v1511_v1  ;;  %v675_v27 = vadd.s32 (!%p177_p6), %v1725_v22, %v650_v23  ;;  %v676_v28 = vadd.s32 (!%p177_p6), %v1725_v22, %v651_v24  ;;  %v674_v29 = vadd.s32 (!%p177_p6), %v1725_v22, %v649_v25  ;;  %v653_v33 = vadd.s32 (!%p177_p6), 40, %v1723_v21 }
  0x11   : > { %1368 = vmatprep.subr.bf16.mxu0 (!%p177_p6), %v1512_v2  ;;  %1406 = vmatprep.subr.bf16.mxu1 (!%p177_p6), %v1512_v2  ;;  %vm697_vm0 = vcmp.lt.s32.totalorder (!%p177_p6), %v673_v26, 512  ;;  %v679_v37 = vadd.s32 (!%p177_p6), %v1725_v22, %v654_v30  ;;  %v677_v41 = vadd.s32 (!%p177_p6), %v1725_v22, %v652_v31  ;;  %v1747_v42 = vadd.s32 (!%p177_p6), %v1725_v22, %v655_v32 }
  0x12   : > { %s217_s5 = scalar_select %p216_p7, %s1680_s26, 63  ;;  %vm699_vm1 = vcmp.lt.s32.totalorder %v675_v27, 512  ;;  %vm700_vm2 = vcmp.lt.s32.totalorder %v676_v28, 512  ;;  %vm698_vm3 = vcmp.lt.s32.totalorder %v674_v29, 512  ;;  %v678_v43 = vadd.s32 %v1725_v22, %v653_v33 }
  0x13   : > { %v658_v47 = vadd.s32 80, %v1723_v21  ;;  %v656_v48 = vadd.s32 64, %v1723_v21  ;;  %v659_v49 = vadd.s32 88, %v1723_v21  ;;  %vm703_vm4 = vcmp.lt.s32.totalorder %v679_v37, 512  ;;  %s231_s30 = scalar_select %p230_p8, %s1660_s18, 2 }
  0x14   : > { %s1191_s6 = sshll.u32 %s217_s5, 2  ;;  %1369 = vmatpush3.bf16.msra.mxu0 %v1512_v2  ;;  %1414 = vmatpush3.bf16.msra.mxu1 %v1512_v2  ;;  %v657_v60 = vadd.s32 72, %v1723_v21  ;;  %vm701_vm5 = vcmp.lt.s32.totalorder %v677_v41, 512  ;;  %vm704_vm6 = vcmp.lt.s32.totalorder %v1747_v42, 512  ;;  %vm702_vm7 = vcmp.lt.s32.totalorder %v678_v43, 512  ;;  %s1272_s12 = smul.u32 (%p1672_p4), 96, %s1660_s18 }
  0x15   : > { %s1696_s11 = scalar_lea.vmem %s1984_s0, %s1191_s6  ;;  %1370 = vmatprep.subr.bf16.mxu0 %v1513_v3  ;;  %1407 = vmatprep.subr.bf16.mxu1 %v1513_v3  ;;  %v1773_v1 = vadd.s32 %v1725_v22, %v658_v47  ;;  %v681_v2 = vadd.s32 %v1725_v22, %v656_v48  ;;  %v661_v27 = vadd.s32 104, %v1723_v21  ;;  %v663_v31 = vadd.s32 120, %v1723_v21  ;;  %s232_s7 = scalar_lea.vmem %s1987_s3, %s231_s30 }
  0x16   : > { %v1518_v4 = vld [vmem:[%s1696_s11] sm:$0xff]   ;;  %v1524_v6 = vld [vmem:[%s1696_s11 + $0x30] sm:$0xff]   ;;  %v1519_v10 = vld [vmem:[%s1696_s11 + $0x8] sm:$0xff]   ;;  %s235_s10 = scalar_lea.vmem %s1988_s4, %s231_s30  ;;  %s1877_s17 = scalar_lea.vmem (%p1672_p4), %s1986_s2, %s1272_s12  }
  0x17   : > { %1380 = vmatprep.mubr.bf16.mxu0 %v1518_v4  ;;  %1392 = vmatprep.mubr.bf16.mxu1 %v1524_v6  ;;  %v1525_v11 = vld [vmem:[%s1696_s11 + $0x38] sm:$0xff]   ;;  %v1520_v12 = vld [vmem:[%s1696_s11 + $0x10] sm:$0xff]   ;;  %v1526_v13 = vld [vmem:[%s1696_s11 + $0x40] sm:$0xff]   ;;  %vm705_vm8 = vcmp.lt.s32.totalorder %v681_v2, 512  ;;  %vm707_vm9 = vcmp.lt.s32.totalorder %v1773_v1, 512  ;;  %v686_v42 = vadd.s32 %v1725_v22, %v661_v27 }
  0x18   : > { %1371 = vmatpush3.bf16.msra.mxu0 %v1513_v3  ;;  %1415 = vmatpush3.bf16.msra.mxu1 %v1513_v3  ;;  %v1521_v14 = vld [vmem:[%s1696_s11 + $0x18] sm:$0xff]   ;;  %v1527_v15 = vld [vmem:[%s1696_s11 + $0x48] sm:$0xff]   ;;  %v1522_v16 = vld [vmem:[%s1696_s11 + $0x20] sm:$0xff]  }
  0x19   : > { %1372 = vmatprep.subr.bf16.mxu0 %v1514_v5  ;;  %1408 = vmatprep.subr.bf16.mxu1 %v1514_v5  ;;  %v1528_v17 = vld [vmem:[%s1696_s11 + $0x50] sm:$0xff]   ;;  %v1523_v18 = vld [vmem:[%s1696_s11 + $0x28] sm:$0xff]   ;;  %v1529_v19 = vld [vmem:[%s1696_s11 + $0x58] sm:$0xff]   ;;  %vm710_vm13 = vcmp.lt.s32.totalorder %v686_v42, 512  ;;  %s843_s11 = ssub.s32 (%p1672_p4), 64, %s1680_s26 }
  0x1a   : > { %p844_p9 = scmp.lt.s32.totalorder (%p1672_p4), %s843_s11, 24 }
  0x1c   : > { %1373 = vmatpush3.bf16.msra.mxu0 %v1514_v5  ;;  %1416 = vmatpush3.bf16.msra.mxu1 %v1514_v5 }
  0x1d   : > { %1374 = vmatprep.subr.bf16.mxu0 %v1515_v7  ;;  %1409 = vmatprep.subr.bf16.mxu1 %v1515_v7 }
  0x20   : > { %1375 = vmatpush3.bf16.msra.mxu0 %v1515_v7  ;;  %1417 = vmatpush3.bf16.msra.mxu1 %v1515_v7 }
  0x21   : > { %1376 = vmatprep.subr.bf16.mxu0 %v1516_v8  ;;  %1410 = vmatprep.subr.bf16.mxu1 %v1516_v8 }
  0x24   : > { %1377 = vmatpush3.bf16.msra.mxu0 %v1516_v8  ;;  %1418 = vmatpush3.bf16.msra.mxu1 %v1516_v8  ;;  %v1779_v8 = vadd.s32 %v1725_v22, %v659_v49 }
  0x25   : > { %1378 = vmatprep.subr.bf16.mxu0 %v1517_v9  ;;  %1411 = vmatprep.subr.bf16.mxu1 %v1517_v9 }
  0x26   : > { %vm708_vm10 = vcmp.lt.s32.totalorder %v1779_v8, 512  ;;  %v667_v8 = vadd.s32 152, %v1723_v21 }
  0x28   : > { %1379 = vmatpush3.bf16.msra.mxu0 %v1517_v9  ;;  %1419 = vmatpush3.bf16.msra.mxu1 %v1517_v9 }
  0x2b   : > { %1381 = vmatmul.mubr.bf16.vlgmr.msra.gmra.mrb[0].mxu0 %v1519_v10  ;;  %1393 = vmatmul.mubr.bf16.vlgmr.msra.gmra.mrb[0].mxu1 %v1525_v11 }
  0x2c   : > { %1384 = vmatprep.mubr.bf16.mxu0 %v1520_v12  ;;  %1396 = vmatprep.mubr.bf16.mxu1 %v1526_v13  ;;  %v682_v12 = vadd.s32 %v1725_v22, %v657_v60  ;;  %v662_v13 = vadd.s32 112, %v1723_v21 }
  0x2e   : > { %vm706_vm11 = vcmp.lt.s32.totalorder %v682_v12, 512  ;;  %v687_v49 = vadd.s32 %v1725_v22, %v662_v13 }
  0x30   : > { %vm711_vm14 = vcmp.lt.s32.totalorder %v687_v49, 512 }
  0x33   : > { %1385 = vmatmul.mubr.bf16.gmra.mrb[4].mxu0 %v1521_v14  ;;  %1397 = vmatmul.mubr.bf16.gmra.mrb[4].mxu1 %v1527_v15  ;;  %v660_v14 = vadd.s32 96, %v1723_v21 }
  0x34   : > { %1388 = vmatprep.mubr.bf16.mxu0 %v1522_v16  ;;  %1400 = vmatprep.mubr.bf16.mxu1 %v1528_v17 }
  0x35   : > { %v685_v33 = vadd.s32 %v1725_v22, %v660_v14 }
  0x37   : > { %vm709_vm12 = vcmp.lt.s32.totalorder %v685_v33, 512 }
  0x3b   : > { %1389 = vmatmul.mubr.bf16.gmra.mrb[8].mxu0 %v1523_v18  ;;  %1401 = vmatmul.mubr.bf16.gmra.mrb[8].mxu1 %v1529_v19 }
  0xfe   : > { %v1382_v34 = vpop.f32.mrb[0].mxu0  ;;  %v1740_v35 = vpop.f32.mrb[0].mxu1 }
  0xff   : > { %v431_v36 = vpop.f32.mrb[1].mxu0  ;;  %v1743_v38 = vpop.f32.mrb[1].mxu1  ;;  %v723_v51 = vsel %vm699_vm1, %v1382_v34, 0.0 }
 0x100   : > { %v721_v39 = vsel %vm697_vm0, %v431_v36, 0.0  ;;  %v1383_v40 = vpop.f32.mrb[2].mxu0  ;;  %v1750_v44 = vpop.f32.mrb[2].mxu1  ;;  %v777_v61 = vmul.f32 %v723_v51, %v723_v51  ;;  %v733_v1 = vsel %vm709_vm12, %v1743_v38, 0.0 }
 0x101   : > { %v1281_v45 = vpack.c.bf16 %v1383_v40, %v1382_v34  ;;  %v434_v46 = vpop.f32.mrb[3].mxu0  ;;  %v1755_v50 = vpop.f32.mrb[3].mxu1  ;;  %v1311_v54 = vpack.c.bf16 %v1750_v44, %v1740_v35  ;;  %v775_v55 = vmul.f32 %v721_v39, %v721_v39  ;;  %v724_v59 = vsel %vm700_vm2, %v1383_v40, 0.0 }
 0x102   : > { %v1276_v52 = vpack.c.bf16 %v434_v46, %v431_v36  ;;  %v722_v53 = vsel %vm698_vm3, %v434_v46, 0.0  ;;  %v1306_v58 = vpack.c.bf16 %v1755_v50, %v1743_v38  ;;  %v778_v4 = vmul.f32 %v724_v59, %v724_v59 }
 0x103   : > { %1333 = vst [vmem:[%s1761_s15 + $0x8] sm:$0xff] %v1281_v45   ;;  %v745_v56 = vadd.f32 %v722_v53, %v721_v39  ;;  %v776_v57 = vmul.f32 %v722_v53, %v722_v53  ;;  %1339 = vst [vmem:[%s1761_s15 + $0x38] sm:$0xff] %v1311_v54   ;;  %v688_v54 = vadd.s32 %v1725_v22, %v663_v31 }
 0x104   : > { %1277 = vst [vmem:[%s1761_s15] sm:$0xff] %v1276_v52   ;;  %1338 = vst [vmem:[%s1761_s15 + $0x30] sm:$0xff] %v1306_v58  }
 0x105   : > { %v746_v62 = vadd.f32 %v745_v56, %v723_v51  ;;  %v799_v63 = vadd.f32 %v776_v57, %v775_v55  ;;  %v664_v55 = vadd.s32 128, %v1723_v21  ;;  %vm712_vm15 = vcmp.lt.s32.totalorder %v688_v54, 512 }
 0x106   : > { %v1386_v0 = vpop.f32.mrb[4].mxu0  ;;  %v1776_v3 = vpop.f32.mrb[4].mxu1 }
 0x107   : > { %v800_v5 = vadd.f32 %v799_v63, %v777_v61  ;;  %v447_v6 = vpop.f32.mrb[5].mxu0  ;;  %v747_v7 = vadd.f32 %v746_v62, %v724_v59  ;;  %v1781_v9 = vpop.f32.mrb[5].mxu1  ;;  %v727_v24 = vsel %vm703_vm4, %v1386_v0, 0.0 }
 0x108   : > { %v725_v10 = vsel %vm701_vm5, %v447_v6, 0.0  ;;  %v1387_v11 = vpop.f32.mrb[6].mxu0  ;;  %v1786_v15 = vpop.f32.mrb[6].mxu1  ;;  %v781_v37 = vmul.f32 %v727_v24, %v727_v24 }
 0x109   : > { %v748_v16 = vadd.f32 %v747_v7, %v725_v10  ;;  %v779_v17 = vmul.f32 %v725_v10, %v725_v10  ;;  %v801_v18 = vadd.f32 %v800_v5, %v778_v4  ;;  %v1291_v19 = vpack.c.bf16 %v1387_v11, %v1386_v0  ;;  %v450_v20 = vpop.f32.mrb[7].mxu0  ;;  %v1788_v23 = vpop.f32.mrb[7].mxu1 }
 0x10a   : > { %v1286_v25 = vpack.c.bf16 %v450_v20, %v447_v6  ;;  %v726_v26 = vsel %vm702_vm7, %v450_v20, 0.0  ;;  %v728_v32 = vsel %vm704_vm6, %v1387_v11, 0.0  ;;  %v1321_v34 = vpack.c.bf16 %v1786_v15, %v1776_v3 }
 0x10b   : > { %v802_v28 = vadd.f32 %v801_v18, %v779_v17  ;;  %1335 = vst [vmem:[%s1761_s15 + $0x18] sm:$0xff] %v1291_v19   ;;  %v749_v29 = vadd.f32 %v748_v16, %v726_v26  ;;  %v780_v30 = vmul.f32 %v726_v26, %v726_v26  ;;  %v1316_v36 = vpack.c.bf16 %v1788_v23, %v1781_v9 }
 0x10c   : > { %1334 = vst [vmem:[%s1761_s15 + $0x10] sm:$0xff] %v1286_v25   ;;  %1341 = vst [vmem:[%s1761_s15 + $0x48] sm:$0xff] %v1321_v34   ;;  %v782_v45 = vmul.f32 %v728_v32, %v728_v32  ;;  %v665_v7 = vadd.s32 136, %v1723_v21  ;;  %v689_v17 = vadd.s32 %v1725_v22, %v664_v55  ;;  %v666_v18 = vadd.s32 144, %v1723_v21 }
 0x10d   : > { %v750_v39 = vadd.f32 %v749_v29, %v727_v24  ;;  %v803_v40 = vadd.f32 %v802_v28, %v780_v30  ;;  %1340 = vst [vmem:[%s1761_s15 + $0x40] sm:$0xff] %v1316_v36   ;;  %v787_v24 = vmul.f32 %v733_v1, %v733_v1  ;;  %v734_v25 = vsel %vm710_vm13, %v1755_v50, 0.0 }
 0x10e   : > { %v1390_v41 = vpop.f32.mrb[8].mxu0  ;;  %v1808_v43 = vpop.f32.mrb[8].mxu1  ;;  %v690_v26 = vadd.s32 %v1725_v22, %v665_v7  ;;  %vm713_vm0 = vcmp.lt.s32.totalorder %v689_v17, 512  ;;  %v668_v29 = vadd.s32 160, %v1723_v21  ;;  %v735_v30 = vsel %vm711_vm14, %v1740_v35, 0.0 }
 0x10f   : > { %v804_v46 = vadd.f32 %v803_v40, %v781_v37  ;;  %v463_v47 = vpop.f32.mrb[9].mxu0  ;;  %v751_v48 = vadd.f32 %v750_v39, %v728_v32  ;;  %v1811_v51 = vpop.f32.mrb[9].mxu1  ;;  %v731_v63 = vsel %vm707_vm9, %v1390_v41, 0.0  ;;  %v691_v31 = vadd.s32 %v1725_v22, %v666_v18 }
 0x110   : > { %v729_v52 = vsel %vm705_vm8, %v463_v47, 0.0  ;;  %v1391_v53 = vpop.f32.mrb[10].mxu0  ;;  %v1815_v56 = vpop.f32.mrb[10].mxu1  ;;  %v785_v13 = vmul.f32 %v731_v63, %v731_v63  ;;  %v788_v34 = vmul.f32 %v734_v25, %v734_v25  ;;  %v692_v36 = vadd.s32 %v1725_v22, %v667_v8 }
 0x111   : > { %v752_v57 = vadd.f32 %v751_v48, %v729_v52  ;;  %v783_v58 = vmul.f32 %v729_v52, %v729_v52  ;;  %v805_v59 = vadd.f32 %v804_v46, %v782_v45  ;;  %v1301_v60 = vpack.c.bf16 %v1391_v53, %v1390_v41  ;;  %v466_v61 = vpop.f32.mrb[11].mxu0  ;;  %v1817_v62 = vpop.f32.mrb[11].mxu1 }
 0x112   : > { %v1296_v0 = vpack.c.bf16 %v466_v61, %v463_v47  ;;  %v730_v2 = vsel %vm706_vm11, %v466_v61, 0.0  ;;  %v732_v10 = vsel %vm708_vm10, %v1391_v53, 0.0  ;;  %v1331_v11 = vpack.c.bf16 %v1815_v56, %v1808_v43 }
 0x113   : > { %v806_v4 = vadd.f32 %v805_v59, %v783_v58  ;;  %1337 = vst [vmem:[%s1761_s15 + $0x28] sm:$0xff] %v1301_v60   ;;  %v753_v5 = vadd.f32 %v752_v57, %v730_v2  ;;  %v784_v6 = vmul.f32 %v730_v2, %v730_v2  ;;  %v1326_v12 = vpack.c.bf16 %v1817_v62, %v1811_v51 }
 0x114   : > { %1336 = vst [vmem:[%s1761_s15 + $0x20] sm:$0xff] %v1296_v0   ;;  %1343 = vst [vmem:[%s1761_s15 + $0x58] sm:$0xff] %v1331_v11   ;;  %v786_v19 = vmul.f32 %v732_v10, %v732_v10  ;;  %v736_v37 = vsel %vm712_vm15, %v1750_v44, 0.0  ;;  %v737_v50 = vsel %vm713_vm0, %v1781_v9, 0.0  ;;  %vm714_vm1 = vcmp.lt.s32.totalorder %v690_v26, 512 }
 0x115   : > { %v754_v14 = vadd.f32 %v753_v5, %v731_v63  ;;  %v807_v16 = vadd.f32 %v806_v4, %v784_v6  ;;  %1342 = vst [vmem:[%s1761_s15 + $0x50] sm:$0xff] %v1326_v12   ;;  %v669_v39 = vadd.s32 168, %v1723_v21  ;;  %v789_v40 = vmul.f32 %v735_v30, %v735_v30 }
 0x116   : > { %v693_v45 = vadd.s32 %v1725_v22, %v668_v29  ;;  %vm715_vm2 = vcmp.lt.s32.totalorder %v691_v31, 512  ;;  %v670_v35 = vadd.s32 176, %v1723_v21  ;;  %v790_v46 = vmul.f32 %v736_v37, %v736_v37 }
 0x117   : > { %v808_v38 = vadd.f32 %v807_v16, %v785_v13  ;;  %v755_v20 = vadd.f32 %v754_v14, %v732_v10  ;;  %v791_v49 = vmul.f32 %v737_v50, %v737_v50  ;;  %vm716_vm3 = vcmp.lt.s32.totalorder %v692_v36, 512 }
 0x118   : > { %v738_v44 = vsel %vm714_vm1, %v1788_v23, 0.0  ;;  %v671_v9 = vadd.s32 184, %v1723_v21  ;;  %vm717_vm4 = vcmp.lt.s32.totalorder %v693_v45, 512  ;;  %v694_v54 = vadd.s32 %v1725_v22, %v669_v39 }
 0x119   : > { %v756_v27 = vadd.f32 %v755_v20, %v733_v1  ;;  %v809_v28 = vadd.f32 %v808_v38, %v786_v19  ;;  %v739_v55 = vsel %vm715_vm2, %v1776_v3, 0.0  ;;  %v695_v57 = vadd.s32 %v1725_v22, %v670_v35 }
 0x11a   : > { %v792_v60 = vmul.f32 %v738_v44, %v738_v44  ;;  %v740_v61 = vsel %vm716_vm3, %v1786_v15, 0.0  ;;  %v741_v63 = vsel %vm717_vm4, %v1811_v51, 0.0  ;;  %v696_v23 = vadd.s32 %v1725_v22, %v671_v9 }
 0x11b   : > { %v810_v32 = vadd.f32 %v809_v28, %v787_v24  ;;  %v757_v33 = vadd.f32 %v756_v27, %v734_v25  ;;  %v793_v0 = vmul.f32 %v739_v55, %v739_v55  ;;  %vm718_vm5 = vcmp.lt.s32.totalorder %v694_v54, 512 }
 0x11c   : > { %vm719_vm6 = vcmp.lt.s32.totalorder %v695_v57, 512  ;;  %v794_v4 = vmul.f32 %v740_v61, %v740_v61  ;;  %v795_v3 = vmul.f32 %v741_v63, %v741_v63  ;;  %v742_v7 = vsel %vm718_vm5, %v1817_v62, 0.0 }
 0x11d   : > { %v758_v41 = vadd.f32 %v757_v33, %v735_v30  ;;  %v811_v42 = vadd.f32 %v810_v32, %v788_v34  ;;  %vm720_vm7 = vcmp.lt.s32.totalorder %v696_v23, 512  ;;  %v743_v15 = vsel %vm719_vm6, %v1808_v43, 0.0 }
 0x11e   : > { %v796_v22 = vmul.f32 %v742_v7, %v742_v7  ;;  %v744_v12 = vsel %vm720_vm7, %v1815_v56, 0.0  ;;  %v797_v13 = vmul.f32 %v743_v15, %v743_v15 }
 0x11f   : > { %v812_v47 = vadd.f32 %v811_v42, %v789_v40  ;;  %v759_v48 = vadd.f32 %v758_v41, %v736_v37  ;;  %v798_v17 = vmul.f32 %v744_v12, %v744_v12 }
 0x121   : > { %v760_v52 = vadd.f32 %v759_v48, %v737_v50  ;;  %v813_v53 = vadd.f32 %v812_v47, %v790_v46 }
 0x123   : > { %v814_v58 = vadd.f32 %v813_v53, %v791_v49  ;;  %v761_v59 = vadd.f32 %v760_v52, %v738_v44 }
 0x125   : > { %v762_v21 = vadd.f32 %v761_v59, %v739_v55  ;;  %v815_v2 = vadd.f32 %v814_v58, %v792_v60 }
 0x127   : > { %v816_v5 = vadd.f32 %v815_v2, %v793_v0  ;;  %v763_v6 = vadd.f32 %v762_v21, %v740_v61 }
 0x129   : > { %v764_v10 = vadd.f32 %v763_v6, %v741_v63  ;;  %v817_v1 = vadd.f32 %v816_v5, %v794_v4 }
 0x12b   : > { %v818_v51 = vadd.f32 %v817_v1, %v795_v3  ;;  %v765_v11 = vadd.f32 %v764_v10, %v742_v7 }
 0x12d   : > { %v766_v14 = vadd.f32 %v765_v11, %v743_v15  ;;  %v819_v16 = vadd.f32 %v818_v51, %v796_v22 }
 0x12f   : > { %v767_v18 = vadd.f32 %v766_v14, %v744_v12  ;;  %v820_v8 = vadd.f32 %v819_v16, %v797_v13 }
 0x131   : > { %v768_v19 = vrot.slane %v767_v18, 4  ;;  %v821_v62 = vadd.f32 %v820_v8, %v798_v17 }
 0x133   : > { %v769_v38 = vadd.f32 %v768_v19, %v767_v18  ;;  %v822_v20 = vrot.slane %v821_v62, 4 }
 0x135   : > { %v770_v24 = vrot.slane %v769_v38, 2  ;;  %v823_v25 = vadd.f32 %v822_v20, %v821_v62 }
 0x137   : > { %v771_v43 = vadd.f32 %v770_v24, %v769_v38  ;;  %v824_v26 = vrot.slane %v823_v25, 2 }
 0x139   : > { %v772_v27 = vrot.slane %v771_v43, 1  ;;  %v825_v28 = vadd.f32 %v824_v26, %v823_v25  ;;  %841 = sbr.rel (!%p1672_p4) target bundleno = 397 (0x18d), region = 32 }
 0x13b   : > { %v773_v56 = vadd.f32 %v772_v27, %v771_v43  ;;  %v826_v29 = vrot.slane %v825_v28, 1 }
 0x13d   : > { %774 = vst [vmem:[%s232_s7] sm:$0x1] %v773_v56  ;;  %v827_v30 = vadd.f32 %v826_v29, %v825_v28 }
 0x13f   : > { %828 = vst [vmem:[%s235_s10] sm:$0x1] %v827_v30 }
 0x140   : > { %s1997_s11 = smov (!%p844_p9, %s843_s11), 24 }
 0x141   : > { %s1236_s20 = sshll.u32 %s1997_s11, 6 }
 0x142   : > { %p1239_p10 = scmp.eq.s32.totalorder %s1236_s20, 0 }
 0x143   : > { %1530 = sdivrem.u32 (!%p1239_p10), %s1997_s11, 24 }
 0x144   : > { %852 = sbr.rel (%p1239_p10) target bundleno = 397 (0x18d), region = 36 }
 0x14c   : > { %s1883_s23 = spop.drf %1530 }
 0x14d   : > { %p1240_p11 = scmp.le.s32.totalorder %s1883_s23, 0 }
 0x14e   : > { %s1990_s18 = smov (!%p1240_p11), %s1877_s17  ;;  %s1991_s26 = smov (!%p1240_p11), %s1761_s15 }
 0x14f   : > { %1125 = sbr.rel (%p1240_p11) target bundleno = 368 (0x170), region = 132  ;;  %s1892_s21 = smov (!%p1240_p11), 0  }
 0x150   : > { %s1894_s24 = smov (!%p1240_p11), 0  }
 0x156 LB: >> { %v869_v31 = vld [vmem:[%s1596_s26] sm:$0xf]  ;;  %v871_v32 = vld [vmem:[%s1596_s26 + $0x4] sm:$0xf]  ;;  %v873_v33 = vld [vmem:[%s1596_s26 + $0x8] sm:$0xf]  ;;  %s1604_s24 = sphi %s1894_s24, %s863_s24   ;;  %s1600_s21 = sphi %s1892_s21, %s1992_s21   ;;  %s1596_s26 = sphi %s1991_s26, %s922_s26   ;;  %s1592_s18 = sphi %s1990_s18, %s923_s18  }
 0x157   : >> { %870 = vst [vmem:[%s1592_s18] sm:$0xf] %v869_v31  ;;  %872 = vst [vmem:[%s1592_s18 + $0x4] sm:$0xf] %v871_v32  ;;  %v875_v34 = vld [vmem:[%s1596_s26 + $0xc] sm:$0xf]  ;;  %s917_s25 = sadd.s32 1, %s1600_s21 }
 0x158   : >> { %874 = vst [vmem:[%s1592_s18 + $0x8] sm:$0xf] %v873_v33  ;;  %v877_v36 = vld [vmem:[%s1596_s26 + $0x10] sm:$0xf]  ;;  %v879_v37 = vld [vmem:[%s1596_s26 + $0x14] sm:$0xf]  ;;  %p918_p12 = scmp.ge.s32.totalorder %s917_s25, %s1883_s23 }
 0x159   : >> { %876 = vst [vmem:[%s1592_s18 + $0xc] sm:$0xf] %v875_v34  ;;  %878 = vst [vmem:[%s1592_s18 + $0x10] sm:$0xf] %v877_v36  ;;  %v881_v50 = vld [vmem:[%s1596_s26 + $0x18] sm:$0xf] }
 0x15a   : >> { %880 = vst [vmem:[%s1592_s18 + $0x14] sm:$0xf] %v879_v37  ;;  %v883_v39 = vld [vmem:[%s1596_s26 + $0x1c] sm:$0xf]  ;;  %v885_v40 = vld [vmem:[%s1596_s26 + $0x20] sm:$0xf] }
 0x15b   : >> { %882 = vst [vmem:[%s1592_s18 + $0x18] sm:$0xf] %v881_v50  ;;  %884 = vst [vmem:[%s1592_s18 + $0x1c] sm:$0xf] %v883_v39  ;;  %v887_v41 = vld [vmem:[%s1596_s26 + $0x24] sm:$0xf] }
 0x15c   : >> { %886 = vst [vmem:[%s1592_s18 + $0x20] sm:$0xf] %v885_v40  ;;  %v889_v42 = vld [vmem:[%s1596_s26 + $0x28] sm:$0xf]  ;;  %v891_v45 = vld [vmem:[%s1596_s26 + $0x2c] sm:$0xf] }
 0x15d   : >> { %888 = vst [vmem:[%s1592_s18 + $0x24] sm:$0xf] %v887_v41  ;;  %890 = vst [vmem:[%s1592_s18 + $0x28] sm:$0xf] %v889_v42  ;;  %v893_v35 = vld [vmem:[%s1596_s26 + $0x30] sm:$0xf] }
 0x15e   : >> { %892 = vst [vmem:[%s1592_s18 + $0x2c] sm:$0xf] %v891_v45  ;;  %v895_v46 = vld [vmem:[%s1596_s26 + $0x34] sm:$0xf]  ;;  %v897_v47 = vld [vmem:[%s1596_s26 + $0x38] sm:$0xf] }
 0x15f   : >> { %894 = vst [vmem:[%s1592_s18 + $0x30] sm:$0xf] %v893_v35  ;;  %896 = vst [vmem:[%s1592_s18 + $0x34] sm:$0xf] %v895_v46  ;;  %v899_v48 = vld [vmem:[%s1596_s26 + $0x3c] sm:$0xf] }
 0x160   : >> { %898 = vst [vmem:[%s1592_s18 + $0x38] sm:$0xf] %v897_v47  ;;  %v901_v49 = vld [vmem:[%s1596_s26 + $0x40] sm:$0xf]  ;;  %v903_v44 = vld [vmem:[%s1596_s26 + $0x44] sm:$0xf] }
 0x161   : >> { %900 = vst [vmem:[%s1592_s18 + $0x3c] sm:$0xf] %v899_v48  ;;  %902 = vst [vmem:[%s1592_s18 + $0x40] sm:$0xf] %v901_v49  ;;  %v905_v9 = vld [vmem:[%s1596_s26 + $0x48] sm:$0xf] }
 0x162   : >> { %904 = vst [vmem:[%s1592_s18 + $0x44] sm:$0xf] %v903_v44  ;;  %v907_v52 = vld [vmem:[%s1596_s26 + $0x4c] sm:$0xf]  ;;  %v909_v53 = vld [vmem:[%s1596_s26 + $0x50] sm:$0xf] }
 0x163   : >> { %906 = vst [vmem:[%s1592_s18 + $0x48] sm:$0xf] %v905_v9  ;;  %908 = vst [vmem:[%s1592_s18 + $0x4c] sm:$0xf] %v907_v52  ;;  %v911_v54 = vld [vmem:[%s1596_s26 + $0x54] sm:$0xf] }
 0x164   : >> { %910 = vst [vmem:[%s1592_s18 + $0x50] sm:$0xf] %v909_v53  ;;  %v913_v55 = vld [vmem:[%s1596_s26 + $0x58] sm:$0xf]  ;;  %v915_v57 = vld [vmem:[%s1596_s26 + $0x5c] sm:$0xf] }
 0x165   : >> { %912 = vst [vmem:[%s1592_s18 + $0x54] sm:$0xf] %v911_v54  ;;  %914 = vst [vmem:[%s1592_s18 + $0x58] sm:$0xf] %v913_v55  ;;  %s1999_s25 = smov (%p918_p12, %s917_s25), 0  ;;  %s863_s24 = sadd.s32 1, %s1604_s24  }
 0x166   : >> { %916 = vst [vmem:[%s1592_s18 + $0x5c] sm:$0xf] %v915_v57  ;;  %s920_s27 = smul.u32 96, %s1999_s25  ;;  %p862_p13 = scmp.ge.s32.totalorder %s863_s24, %s1883_s23 }
 0x167   : >> { %s1992_s21 = smov %s1999_s25 }
 0x168   : >> { %s922_s26 = scalar_lea.vmem %s1761_s15, %s920_s27 [#allocation2]   ;;  %s923_s18 = scalar_lea.vmem %s1877_s17, %s920_s27  }
 0x169   : > { %865 = sbr.rel (!%p862_p13) target bundleno = 342 (0x156), region = 138 }
 0x170 PF: > { %1532 = sdivrem.u32 %s1997_s11, 24 }
 0x171   : > { %s1241_s28 = smul.u32 96, %s1883_s23 }
 0x173   : > { %s928_s29 = scalar_lea.vmem %s1761_s15, %s1241_s28 [#allocation2]   ;;  %s930_s30 = scalar_lea.vmem %s1877_s17, %s1241_s28  }
 0x179   : > { %s1533_s5 = spop.drf %1532 }
 0x17a   : > { %p1243_p0 = scmp.le.s32.totalorder %s1533_s5, 0 }
 0x17b   : > { %s1606_s6 = smov (!%p1243_p0), %s930_s30   ;;  %s1610_s7 = smov (!%p1243_p0), %s928_s29  }
 0x17c   : > { %1139 = sbr.rel (%p1243_p0) target bundleno = 397 (0x18d), region = 143  ;;  %s1614_s8 = smov (!%p1243_p0), 0  }
 0x17d   : > { %s1618_s9 = smov (!%p1243_p0), 0  }
 0x183 LB: >> { %v940_v58 = vld [vmem:[%s1612_s7] sm:$0xf]  ;;  %s942_s10 = sadd.s32 1, %s1616_s8  ;;  %s934_s9 = sadd.s32 1, %s1620_s9   ;;  %s1620_s9 = sphi %s1618_s9, %s934_s9   ;;  %s1616_s8 = sphi %s1614_s8, %s1615_s8   ;;  %s1612_s7 = sphi %s1610_s7, %s947_s7   ;;  %s1608_s6 = sphi %s1606_s6, %s948_s6  }
 0x184   : >> { %941 = vst [vmem:[%s1608_s6] sm:$0xf] %v940_v58  ;;  %p943_p1 = scmp.ge.s32.totalorder %s942_s10, %s1533_s5  ;;  %p933_p2 = scmp.ge.s32.totalorder %s934_s9, %s1533_s5 }
 0x186   : >> { %s2001_s10 = smov (%p943_p1, %s942_s10), 0  ;;  %936 = sbr.rel (!%p933_p2) target bundleno = 387 (0x183), region = 149 }
 0x187   : >> { %s1244_s15 = sshll.u32 %s2001_s10, 2  ;;  %s1615_s8 = smov %s2001_s10  }
 0x188   : >> { %s947_s7 = scalar_lea.vmem %s928_s29, %s1244_s15 [#allocation2]   ;;  %s948_s6 = scalar_lea.vmem %s930_s30, %s1244_s15  }
 0x18d PF: > { %p12_p3 = scmp.ge.s32.totalorder %s1662_s19, 5   ;;  %s1993_s15 = smov %s1584_s16 }
 0x18e   : > { %s1994_s16 = smov %s1670_s22  ;;  %s1995_s17 = smov %s1662_s19 }
 0x18f   :  { %14 = sbr.rel (!%p12_p3) target bundleno = 2 (0x2), region = 160 }

</bundles_post_ra>
